<compile_context>
chip_gen: v7x
topology: tpu7x:2x2x1
jax: 0.10.0
libtpu: 0.0.40
codegen_flags: <defaults>
</compile_context>

<pallas_src>
import jax
import jax.numpy as jnp
from jax.experimental import pallas as pl
from jax.experimental.pallas import tpu as pltpu


def _copy_kernel(x_hbm, o_hbm, sem):
    # One whole-array HBM->HBM DMA: no grid, no VMEM staging, no compute.
    cp = pltpu.make_async_copy(x_hbm, o_hbm, sem)
    cp.start()
    cp.wait()


def _materialize_squeezed_copy(x):
    """Fresh-buffer copy of x=(B, C, 1), returned as (B, C).

    The DMA copies the full (B, C, 1) slab into a new HBM buffer; the final
    squeeze of the trailing size-1 dim is a free metadata op on that fresh
    buffer (byte-identical layouts).
    """
    B, C, L = x.shape
    nbytes = x.size * jnp.dtype(x.dtype).itemsize
    out3d = pl.pallas_call(
        _copy_kernel,
        out_shape=jax.ShapeDtypeStruct((B, C, L), x.dtype),
        in_specs=[pl.BlockSpec(memory_space=pl.ANY)],
        out_specs=pl.BlockSpec(memory_space=pl.ANY),
        scratch_shapes=[pltpu.SemaphoreType.DMA(())],
        cost_estimate=pl.CostEstimate(
            flops=0, transcendentals=0, bytes_accessed=2 * nbytes
        ),
    )(x)
    return jnp.squeeze(out3d, axis=2)


def squeeze_channels(x, *, force_pallas=False):
    """Pallas/JAX equivalent of torch.Tensor.squeeze(2) for a 3-D tensor.

    Default path is a zero-cost metadata squeeze.  Set force_pallas=True only
    if a freshly materialized output buffer is explicitly required; that path
    is a single HBM->HBM DMA (works for any (B, C, 1), any dtype).
    """
    assert x.ndim == 3, "SqueezeChannels expects a 3-D tensor (B, C, L)"
    if x.shape[2] != 1:
        # torch.squeeze(dim=2) is a no-op when that dim is not of size 1.
        return x
    if not force_pallas:
        # (B, C, 1) and (B, C) are byte-identical: pure metadata squeeze,
        # no HBM traffic, no custom-call overhead.  This is the right default.
        return jnp.squeeze(x, axis=2)
    return _materialize_squeezed_copy(x)


if __name__ == "__main__":
    key = jax.random.PRNGKey(0)

    # Shape matching the module's use in CausalCNN: (B, C, 1) after
    # AdaptiveMaxPool1d(1).  Small, deterministic.
    B, C, L = 2, 4, 1
    x = jax.random.normal(key, (B, C, L), dtype=jnp.float32)
    ref = jnp.squeeze(x, axis=2)

    # 1) Default zero-cost metadata path.
    y = jax.block_until_ready(squeeze_channels(x))
    assert y.shape == (B, C) and y.dtype == x.dtype
    assert jnp.array_equal(y, ref), "metadata-squeeze path mismatch"

    # 2) Pallas HBM->HBM DMA path (run once to verify it compiles and runs
    #    cleanly on TPU; no alignment requirements).
    y_pallas = jax.block_until_ready(squeeze_channels(x, force_pallas=True))
    assert y_pallas.shape == (B, C) and y_pallas.dtype == x.dtype
    assert jnp.array_equal(y_pallas, ref), "pallas DMA path mismatch"

    # 3) Non-size-1 third dim: torch.squeeze(2) no-op behaviour.
    x_noop = jax.random.normal(jax.random.PRNGKey(2), (2, 4, 16),
                               dtype=jnp.float32)
    y_noop = jax.block_until_ready(squeeze_channels(x_noop))
    assert y_noop.shape == x_noop.shape and jnp.array_equal(y_noop, x_noop)

    print("KERNEL_OK")
</pallas_src>

<mosaic_0001>
module attributes {stable_mosaic.version = 11 : i64} {
  func.func @_copy_kernel(%arg0: memref<2x4x1xf32, #tpu.memory_space<any>>, %arg1: memref<2x4x1xf32, #tpu.memory_space<any>>, %arg2: memref<!tpu.dma_semaphore, #tpu.memory_space<semaphore_mem>>) attributes {dimension_semantics = [], scalar_prefetch = 0 : i64, scratch_operands = 1 : i64, tpu.core_type = #tpu.core_type<tc>} {
    tpu.enqueue_dma source(%arg0 : memref<2x4x1xf32, #tpu.memory_space<any>>) target(%arg1 : memref<2x4x1xf32, #tpu.memory_space<any>>) target_semaphore(%arg2 : memref<!tpu.dma_semaphore, #tpu.memory_space<semaphore_mem>>)
    tpu.wait_dma2 semaphore(%arg2 : memref<!tpu.dma_semaphore, #tpu.memory_space<semaphore_mem>>) src(%arg0 : memref<2x4x1xf32, #tpu.memory_space<any>>) dst(%arg1 : memref<2x4x1xf32, #tpu.memory_space<any>>)
    return
  }
}

</mosaic_0001>

<bundles_post_ra>
// kernel: tpu_custom_call.1
= control target key start
LH: loop header
LB: loop body
LE: loop exit
PB: predicated region body
PF: predicated region fallthrough
CT: control target
= control target key end

     0   :  { %s85_s0 = inlined_call_operand.vmem [shape: f32[2,4,1], index: 0, kind: input, shape index: {}]   ;;  %s86_s1 = inlined_call_operand.vmem [shape: f32[2,4,1], index: 1, kind: output, shape index: {}]  }
   0x1   :  { %v38_v0 = vld [vmem:[%s85_s0] sm:$0xff] }
   0x2   :  { %39 = vst [vmem:[%s86_s1] sm:$0xff] %v38_v0 }
   0x3   :  { %47 = vsyncadd [#allocation2], 128 }
   0x4   :  { %67 = dma.done.wait [#allocation2], 128 }
   0x5   :  { %68 = vsyncadd [#allocation2], 4294967168 }
   0x6   :  { %52 = vsyncmov [#allocation2] }
   0x9   :  { %s53_s10 = vpop.sfrf %52 }
   0xa   :  { %p66_p0 = scmp.ne.s32.totalorder %s53_s10, 0 }
   0xc   :  { %57 = shalt.err (%p66_p0)  }

</bundles_post_ra>
